<compile_context>
chip_gen: v5e
topology: v5e:2x2
jax: 0.10.0
libtpu: 0.0.40
codegen_flags: <defaults>
</compile_context>

<pallas_src>
import jax
import jax.numpy as jnp
from jax.experimental import pallas as pl
from jax.experimental.pallas import tpu as pltpu

LANE = 128


def _round_up(n, m):
    return ((n + m - 1) // m) * m


def value_net_kernel(x_ref, w1_ref, b1_ref, w2_ref, b2_ref, w3_ref, b3_ref, o_ref):
    # Layer 1: Linear(in_dim -> Hp) + ReLU   (bf16 MXU, f32 accumulate)
    h1 = jnp.dot(x_ref[...], w1_ref[...], preferred_element_type=jnp.float32)
    h1 = jnp.maximum(h1 + b1_ref[...], 0.0)
    # Layer 2: Linear(Hp -> Hp) + ReLU
    h2 = jnp.dot(h1.astype(jnp.bfloat16), w2_ref[...],
                 preferred_element_type=jnp.float32)
    h2 = jnp.maximum(h2 + b2_ref[...], 0.0)
    # Layer 3: Linear(Hp -> 1).  An N=1 MXU matmul wastes the MXU/result path;
    # use a VPU multiply with the lane-dense (1, Hp) weight row + lane reduce.
    out = jnp.sum(h2 * w3_ref[...], axis=-1, keepdims=True)   # (TB, 1) f32
    o_ref[...] = out + b3_ref[0, 0]                           # scalar bias from SMEM


def value_network_forward(x, params, *, block_batch=512):
    """x: (B, in_dim) -> (B,) float32 (matches PyTorch's .view(B))."""
    w1, b1, w2, b2, w3, b3 = params
    B, in_dim = x.shape
    hp = w1.shape[1]

    # Batch tile: large (pipeline efficiency), multiple of 8 sublanes, capped at B.
    tb = min(block_batch, _round_up(B, 8))
    b_pad = _round_up(B, tb)

    # bf16 x stream halves HBM bytes on the dominant operand.  (Ideally the
    # caller already holds observations in bf16 so this cast is free.)
    xb = x.astype(jnp.bfloat16)
    if b_pad != B:
        xb = jnp.pad(xb, ((0, b_pad - B), (0, 0)))  # zero rows, sliced off below

    grid = (b_pad // tb,)

    out = pl.pallas_call(
        value_net_kernel,
        out_shape=jax.ShapeDtypeStruct((b_pad, 1), jnp.float32),
        grid=grid,
        in_specs=[
            # x: streamed, double-buffered by the BlockSpec pipeline.
            # (On v6e with exposed DMA, pipeline_mode=pl.Buffered(3) is an option.)
            pl.BlockSpec((tb, in_dim), lambda i: (i, 0)),
            # Weights / biases: constant index maps -> fetched once, resident.
            pl.BlockSpec((in_dim, hp), lambda i: (0, 0)),   # w1 (bf16)
            pl.BlockSpec((1, hp), lambda i: (0, 0)),        # b1 (f32)
            pl.BlockSpec((hp, hp), lambda i: (0, 0)),       # w2 (bf16)
            pl.BlockSpec((1, hp), lambda i: (0, 0)),        # b2 (f32)
            pl.BlockSpec((1, hp), lambda i: (0, 0)),        # w3 row (f32)
            # b3: single scalar in SMEM (no (8,128)-padded VMEM tile for it).
            pl.BlockSpec((1, 1), lambda i: (0, 0), memory_space=pltpu.SMEM),
        ],
        out_specs=pl.BlockSpec((tb, 1), lambda i: (i, 0)),
        compiler_params=pltpu.CompilerParams(
            dimension_semantics=("parallel",),      # v7x: shard grid over 2 TCs
            vmem_limit_bytes=32 * 1024 * 1024,      # explicit; safe on v7x's 64 MiB
        ),
    )(xb, w1, b1, w2, b2, w3, b3)

    return out[:B, 0]


def init_params(key, in_dim, hidden_dim=64):
    """PyTorch-default-style uniform init.  Hidden dim is zero-padded to 128
    lanes (exact), weights stored as (in_features, out_features) so the kernel
    computes x @ W + b; MXU-facing weights are bf16."""
    hp = _round_up(hidden_dim, LANE)
    ks = jax.random.split(key, 6)

    def uniform(k, shape, fan_in):
        bound = float(fan_in) ** -0.5
        return jax.random.uniform(k, shape, jnp.float32, -bound, bound)

    w1 = jnp.zeros((in_dim, hp), jnp.float32).at[:, :hidden_dim].set(
        uniform(ks[0], (in_dim, hidden_dim), in_dim))
    b1 = jnp.zeros((1, hp), jnp.float32).at[:, :hidden_dim].set(
        uniform(ks[1], (1, hidden_dim), in_dim))
    w2 = jnp.zeros((hp, hp), jnp.float32).at[:hidden_dim, :hidden_dim].set(
        uniform(ks[2], (hidden_dim, hidden_dim), hidden_dim))
    b2 = jnp.zeros((1, hp), jnp.float32).at[:, :hidden_dim].set(
        uniform(ks[3], (1, hidden_dim), hidden_dim))
    # Layer-3 weight stored as a lane-dense (1, hp) row for the VPU reduce.
    w3 = jnp.zeros((1, hp), jnp.float32).at[:, :hidden_dim].set(
        uniform(ks[4], (1, hidden_dim), hidden_dim))
    b3 = uniform(ks[5], (1, 1), hidden_dim)

    return (w1.astype(jnp.bfloat16), b1, w2.astype(jnp.bfloat16), b2, w3, b3)


def reference_forward(x, params):
    """Pure-JAX reference emulating the kernel's bf16-matmul / f32-accumulate math."""
    w1, b1, w2, b2, w3, b3 = params
    xb = x.astype(jnp.bfloat16)
    h1 = jnp.maximum(jnp.dot(xb, w1, preferred_element_type=jnp.float32) + b1, 0.0)
    h2 = jnp.maximum(jnp.dot(h1.astype(jnp.bfloat16), w2,
                             preferred_element_type=jnp.float32) + b2, 0.0)
    return jnp.sum(h2 * w3, axis=-1) + b3[0, 0]


if __name__ == "__main__":
    key = jax.random.PRNGKey(0)
    k_x, k_x2, k_p = jax.random.split(key, 3)

    in_dim, hidden = 32, 64
    params = init_params(k_p, in_dim, hidden)

    # Small case — exercises tail padding (B=10 -> TB=16, 6 padded rows).
    B = 10
    x = jax.random.normal(k_x, (B, in_dim), dtype=jnp.float32)
    out = jax.block_until_ready(value_network_forward(x, params))
    ref = reference_forward(x, params)
    assert out.shape == (B,), f"bad output shape {out.shape}"
    assert jnp.allclose(out, ref, atol=1e-3, rtol=1e-3), "mismatch vs reference (small)"

    # Larger batch — exercises a multi-step pipelined grid (TB=256, grid=(4,)).
    B2 = 1000
    x2 = jax.random.normal(k_x2, (B2, in_dim), dtype=jnp.float32)
    out2 = jax.block_until_ready(value_network_forward(x2, params, block_batch=256))
    ref2 = reference_forward(x2, params)
    assert out2.shape == (B2,), f"bad output shape {out2.shape}"
    assert jnp.allclose(out2, ref2, atol=1e-3, rtol=1e-3), "mismatch vs reference (large)"

    print("KERNEL_OK")
</pallas_src>

<mosaic_0001>
module attributes {stable_mosaic.version = 11 : i64} {
  func.func @value_net_kernel(%arg0: i32, %arg1: memref<16x32xbf16, #tpu.memory_space<vmem>>, %arg2: memref<32x128xbf16, #tpu.memory_space<vmem>>, %arg3: memref<1x128xf32, #tpu.memory_space<vmem>>, %arg4: memref<128x128xbf16, #tpu.memory_space<vmem>>, %arg5: memref<1x128xf32, #tpu.memory_space<vmem>>, %arg6: memref<1x128xf32, #tpu.memory_space<vmem>>, %arg7: memref<1x1xf32, #tpu.memory_space<smem>>, %arg8: memref<16x1xf32, #tpu.memory_space<vmem>>) attributes {dimension_semantics = [#tpu.dimension_semantics<parallel>], iteration_bounds = array<i64: 1>, scalar_prefetch = 0 : i64, scratch_operands = 0 : i64, tpu.core_type = #tpu.core_type<tc>, window_params = [{transform_indices = @transform_0, window_bounds = array<i64: 16, 32>}, {pipeline_mode = #tpu.pipeline_mode<synchronous>, transform_indices = @transform_1, window_bounds = array<i64: 32, 128>}, {pipeline_mode = #tpu.pipeline_mode<synchronous>, transform_indices = @transform_2, window_bounds = array<i64: 1, 128>}, {pipeline_mode = #tpu.pipeline_mode<synchronous>, transform_indices = @transform_3, window_bounds = array<i64: 128, 128>}, {pipeline_mode = #tpu.pipeline_mode<synchronous>, transform_indices = @transform_4, window_bounds = array<i64: 1, 128>}, {pipeline_mode = #tpu.pipeline_mode<synchronous>, transform_indices = @transform_5, window_bounds = array<i64: 1, 128>}, {transform_indices = @transform_6, window_bounds = array<i64: 1, 1>}, {transform_indices = @transform_7, window_bounds = array<i64: 16, 1>}]} {
    %c0 = arith.constant 0 : index
    %c0_0 = arith.constant 0 : index
    %0 = vector.load %arg1[%c0, %c0_0] : memref<16x32xbf16, #tpu.memory_space<vmem>>, vector<16x32xbf16>
    %c0_1 = arith.constant 0 : index
    %c0_2 = arith.constant 0 : index
    %1 = vector.load %arg2[%c0_1, %c0_2] : memref<32x128xbf16, #tpu.memory_space<vmem>>, vector<32x128xbf16>
    %cst = arith.constant dense<0.000000e+00> : vector<16x128xf32>
    %2 = tpu.matmul %0, %1, %cst {dimension_numbers = #tpu.dot_dimension_numbers<[1], [0], [0], [1], [0, 0, 1, 1], [], []>} : vector<16x32xbf16>, vector<32x128xbf16>, vector<16x128xf32> -> vector<16x128xf32>
    %c0_3 = arith.constant 0 : index
    %c0_4 = arith.constant 0 : index
    %3 = vector.load %arg3[%c0_3, %c0_4] : memref<1x128xf32, #tpu.memory_space<vmem>>, vector<1x128xf32>
    %4 = vector.broadcast %3 : vector<1x128xf32> to vector<16x128xf32>
    %5 = arith.addf %2, %4 : vector<16x128xf32>
    %cst_5 = arith.constant 0.000000e+00 : f32
    %6 = vector.broadcast %cst_5 : f32 to vector<16x128xf32>
    %7 = arith.maximumf %5, %6 : vector<16x128xf32>
    %8 = arith.truncf %7 : vector<16x128xf32> to vector<16x128xbf16>
    %c0_6 = arith.constant 0 : index
    %c0_7 = arith.constant 0 : index
    %9 = vector.load %arg4[%c0_6, %c0_7] : memref<128x128xbf16, #tpu.memory_space<vmem>>, vector<128x128xbf16>
    %cst_8 = arith.constant dense<0.000000e+00> : vector<16x128xf32>
    %10 = tpu.matmul %8, %9, %cst_8 {dimension_numbers = #tpu.dot_dimension_numbers<[1], [0], [0], [1], [0, 0, 1, 1], [], []>} : vector<16x128xbf16>, vector<128x128xbf16>, vector<16x128xf32> -> vector<16x128xf32>
    %c0_9 = arith.constant 0 : index
    %c0_10 = arith.constant 0 : index
    %11 = vector.load %arg5[%c0_9, %c0_10] : memref<1x128xf32, #tpu.memory_space<vmem>>, vector<1x128xf32>
    %12 = vector.broadcast %11 : vector<1x128xf32> to vector<16x128xf32>
    %13 = arith.addf %10, %12 : vector<16x128xf32>
    %cst_11 = arith.constant 0.000000e+00 : f32
    %14 = vector.broadcast %cst_11 : f32 to vector<16x128xf32>
    %15 = arith.maximumf %13, %14 : vector<16x128xf32>
    %c0_12 = arith.constant 0 : index
    %c0_13 = arith.constant 0 : index
    %16 = vector.load %arg6[%c0_12, %c0_13] : memref<1x128xf32, #tpu.memory_space<vmem>>, vector<1x128xf32>
    %17 = vector.broadcast %16 : vector<1x128xf32> to vector<16x128xf32>
    %18 = arith.mulf %15, %17 : vector<16x128xf32>
    %cst_14 = arith.constant dense<0.000000e+00> : vector<16xf32>
    %19 = vector.multi_reduction <add>, %18, %cst_14 [1] : vector<16x128xf32> to vector<16xf32>
    %20 = vector.shape_cast %19 : vector<16xf32> to vector<16x1xf32>
    %c0_15 = arith.constant 0 : index
    %c0_16 = arith.constant 0 : index
    %21 = memref.load %arg7[%c0_15, %c0_16] : memref<1x1xf32, #tpu.memory_space<smem>>
    %22 = vector.broadcast %21 : f32 to vector<16x1xf32>
    %23 = arith.addf %20, %22 : vector<16x1xf32>
    %c0_17 = arith.constant 0 : index
    %c0_18 = arith.constant 0 : index
    %24 = vector.load %arg8[%c0_17, %c0_18] : memref<16x1xf32, #tpu.memory_space<vmem>>, vector<16x1xf32>
    tpu.vector_store %arg8[%c0_17, %c0_18], %23 {strides = array<i32>} : memref<16x1xf32, #tpu.memory_space<vmem>>, vector<16x1xf32>,
    return
  }
  func.func @transform_0(%arg0: i32) -> (i32, i32) {
    %c0_i32 = arith.constant 0 : i32
    %c0_i32_0 = arith.constant 0 : i32
    return %arg0, %c0_i32 : i32, i32
  }
  func.func @transform_1(%arg0: i32) -> (i32, i32) {
    %c0_i32 = arith.constant 0 : i32
    %c0_i32_0 = arith.constant 0 : i32
    %c0_i32_1 = arith.constant 0 : i32
    return %c0_i32, %c0_i32_0 : i32, i32
  }
  func.func @transform_2(%arg0: i32) -> (i32, i32) {
    %c0_i32 = arith.constant 0 : i32
    %c0_i32_0 = arith.constant 0 : i32
    %c0_i32_1 = arith.constant 0 : i32
    return %c0_i32, %c0_i32_0 : i32, i32
  }
  func.func @transform_3(%arg0: i32) -> (i32, i32) {
    %c0_i32 = arith.constant 0 : i32
    %c0_i32_0 = arith.constant 0 : i32
    %c0_i32_1 = arith.constant 0 : i32
    return %c0_i32, %c0_i32_0 : i32, i32
  }
  func.func @transform_4(%arg0: i32) -> (i32, i32) {
    %c0_i32 = arith.constant 0 : i32
    %c0_i32_0 = arith.constant 0 : i32
    %c0_i32_1 = arith.constant 0 : i32
    return %c0_i32, %c0_i32_0 : i32, i32
  }
  func.func @transform_5(%arg0: i32) -> (i32, i32) {
    %c0_i32 = arith.constant 0 : i32
    %c0_i32_0 = arith.constant 0 : i32
    %c0_i32_1 = arith.constant 0 : i32
    return %c0_i32, %c0_i32_0 : i32, i32
  }
  func.func @transform_6(%arg0: i32) -> (i32, i32) {
    %c0_i32 = arith.constant 0 : i32
    %c0_i32_0 = arith.constant 0 : i32
    %c0_i32_1 = arith.constant 0 : i32
    return %c0_i32, %c0_i32_0 : i32, i32
  }
  func.func @transform_7(%arg0: i32) -> (i32, i32) {
    %c0_i32 = arith.constant 0 : i32
    %c0_i32_0 = arith.constant 0 : i32
    return %arg0, %c0_i32 : i32, i32
  }
}

</mosaic_0001>

<bundles_post_ra>
// kernel: tpu_custom_call.1
= control target key start
LH: loop header
LB: loop body
LE: loop exit
PB: predicated region body
PF: predicated region fallthrough
CT: control target
= control target key end

     0   :  { %13 = vsyncpa [#allocation4], 0  ;;  %s442_s0 = inlined_call_operand.hbm [shape: bf16[16,32], index: 0, kind: input, shape index: {}]   ;;  %s443_s1 = inlined_call_operand.hbm [shape: bf16[32,128], index: 1, kind: input, shape index: {}]   ;;  %s444_s2 = inlined_call_operand.vmem [shape: f32[1,128], index: 2, kind: input, shape index: {}]   ;;  %s445_s3 = inlined_call_operand.hbm [shape: bf16[128,128], index: 3, kind: input, shape index: {}]   ;;  %s446_s4 = inlined_call_operand.vmem [shape: f32[1,128], index: 4, kind: input, shape index: {}]   ;;  %s447_s5 = inlined_call_operand.vmem [shape: f32[1,128], index: 5, kind: input, shape index: {}]   ;;  %s448_s6 = inlined_call_operand.<no memory space> [shape: f32[1,1], index: 6, kind: input, shape index: {}]   ;;  %s449_s7 = inlined_call_operand.vmem [shape: f32[16,1], index: 7, kind: output, shape index: {}]  }
   0x1   :  { %14 = vsyncpa [#allocation6], 0  ;;  %s32_s26 = sshll.u32 %s443_s1, 4  ;;  %s370_s27 = smov [#allocation5]   ;;  %s33_s26 = int_to_ptr.hbm [resolvable:$true] %s32_s26 }
   0x2   :  { %s34_s28 = sshll.u32 %s370_s27, 4  ;;  %s19_s8 = sshll.u32 %s442_s0, 4  ;;  %s35_s28 = int_to_ptr.vmem [resolvable:$true] %s34_s28  ;;  %s20_s8 = int_to_ptr.hbm [resolvable:$true] %s19_s8 }
   0x3   :  { %s371_s9 = smov 64   ;;  %s372_s10 = smov 4  }
   0x4   :  { %40 = dma.hbm_to_vmem [thread:$0]  %s33_s26, 256, %s35_s28, [#allocation6], %s371_s9, %s371_s9, %s372_s10  }
   0x5   :  { %s373_s11 = smov [#allocation3]   ;;  %s47_s15 = sshll.u32 %s445_s3, 4  ;;  %s48_s15 = int_to_ptr.hbm [resolvable:$true] %s47_s15 }
   0x6   :  { %s21_s12 = sshll.u32 %s373_s11, 4  ;;  %s374_s1 = smov [#allocation7]   ;;  %s22_s12 = int_to_ptr.vmem [resolvable:$true] %s21_s12 }
   0x7   :  { %27 = dma.hbm_to_vmem [thread:$0]  %s20_s8, 128, %s22_s12, [#allocation4], %s371_s9, %s371_s9, %s372_s10  }
   0x8   :  { %s49_s16 = sshll.u32 %s374_s1, 4  ;;  %s50_s16 = int_to_ptr.vmem [resolvable:$true] %s49_s16 }
   0x9   :  { %55 = dma.hbm_to_vmem [thread:$0]  %s48_s15, 1024, %s50_s16, [#allocation6], %s371_s9, %s371_s9, %s372_s10  }
   0xa   :  { %366 = dma.done.wait [#allocation4], 128  }
   0xb   :  { %367 = vsyncadd [#allocation4], 4294967168 }
   0xc   :  { %368 = dma.done.wait [#allocation6], 1280  }
   0xd   :  { %369 = vsyncadd [#allocation6], 4294966016  ;;  %v277_v0 = vld [vmem:[#allocation5 + $0x8] sm:$0xff]  ;;  %v276_v2 = vld [vmem:[#allocation5] sm:$0xff]  ;;  %vm102_vm0 = vcmask 261120   ;;  %v218_v29 = vstv %s448_s6  ;;  %vm221_vm1 = vcmask 7168  }
   0xe   :  { %v285_v1 = vld [vmem:[#allocation7 + $0x38] sm:$0xff]  ;;  %112 = vmatpush.bf16.msra.mxu0 %v277_v0  ;;  %v284_v3 = vld [vmem:[#allocation7 + $0x30] sm:$0xff]  ;;  %v275_v4 = vld [vmem:[#allocation3] sm:$0xff] }
   0xf   :  { %191 = vmatpush.bf16.msra.mxu1 %v285_v1  ;;  %v283_v5 = vld [vmem:[#allocation7 + $0x28] sm:$0xff]  ;;  %v282_v6 = vld [vmem:[#allocation7 + $0x20] sm:$0xff]  ;;  %v281_v7 = vld [vmem:[#allocation7 + $0x18] sm:$0xff] }
  0x10   :  { %v280_v8 = vld [vmem:[#allocation7 + $0x10] sm:$0xff]  ;;  %v279_v9 = vld [vmem:[#allocation7 + $0x8] sm:$0xff]  ;;  %v278_v10 = vld [vmem:[#allocation7] sm:$0xff] }
  0x11   :  { %v291_v12 = vld [vmem:[%s444_s2] ss:$0 sm:$0xff] }
  0x12   :  { %113 = vmatpush.bf16.msra.mxu0 %v276_v2  ;;  %v292_v19 = vld [vmem:[%s446_s4] ss:$0 sm:$0xff] }
  0x13   :  { %192 = vmatpush.bf16.msra.mxu1 %v284_v3  ;;  %v293_v22 = vld [vmem:[%s447_s5] ss:$0 sm:$0xff] }
  0x15   :  { %242 = vmatmul.msk.bf16.vlgmr.msra.gmra.mxu0 %vm102_vm0, %v275_v4 }
  0x17   :  { %193 = vmatpush.bf16.msra.mxu1 %v283_v5 }
  0x1b   :  { %194 = vmatpush.bf16.msra.mxu1 %v282_v6 }
  0x1f   :  { %195 = vmatpush.bf16.msra.mxu1 %v281_v7 }
  0x23   :  { %196 = vmatpush.bf16.msra.mxu1 %v280_v8 }
  0x27   :  { %197 = vmatpush.bf16.msra.mxu1 %v279_v9 }
  0x2b   :  { %198 = vmatpush.bf16.msra.mxu1 %v278_v10 }
  0x92   :  { %v115_v11 = vpop.f32.mrf.mxu0 }
  0x93   :  { %v116_v13 = vadd.f32 %v291_v12, %v115_v11 }
  0x95   :  { %v120_v16 = vmax.f32 %v116_v13, 0.0 }
  0x9a   :  { %v117_v14 = vpop.f32.mrf.mxu0 }
  0x9b   :  { %v118_v15 = vadd.f32 %v291_v12, %v117_v14 }
  0x9d   :  { %v121_v17 = vmax.f32 %v118_v15, 0.0 }
  0x9f   :  { %v122_v18 = vpack.c.bf16 %v121_v17, %v120_v16 }
  0xa1   :  { %199 = vmatmul.bf16.vlgmr.msra.gmra.mxu1 %v122_v18 }
 0x11e   :  { %v200_v20 = vpop.f32.mrf.mxu1 }
 0x11f   :  { %v201_v21 = vadd.f32 %v292_v19, %v200_v20 }
 0x121   :  { %v205_v23 = vmax.f32 %v201_v21, 0.0 }
 0x123   :  { %v211_v24 = vmul.f32 %v293_v22, %v205_v23 }
 0x125   :  { %213 = vadd.xlane.f32.xlu0 %v211_v24 }
 0x126   :  { %v202_v25 = vpop.f32.mrf.mxu1 }
 0x127   :  { %v203_v26 = vadd.f32 %v292_v19, %v202_v25 }
 0x129   :  { %v206_v27 = vmax.f32 %v203_v26, 0.0 }
 0x12b   :  { %v212_v28 = vmul.f32 %v293_v22, %v206_v27 }
 0x12d   :  { %215 = vadd.xlane.f32.xlu0 %v212_v28 }
 0x198   :  { %v214_v30 = vpop.xlane.xlu0 %213 }
 0x199   :  { %v219_v31 = vadd.f32 %v218_v29, %v214_v30 }
 0x19b   :  { %222 = vst.msk [vmem:[%s449_s7] sm:$0xff] %vm221_vm1, %v219_v31 }
 0x1a0   :  { %v216_v32 = vpop.xlane.xlu0 %215 }
 0x1a1   :  { %v220_v33 = vadd.f32 %v218_v29, %v216_v32 }
 0x1a3   :  { %223 = vst.msk [vmem:[%s449_s7 + $0x8] sm:$0xff] %vm221_vm1, %v220_v33 }
 0x1a4   :  { %228 = vsyncpa [#allocation4], 1 }
 0x1a5   :  { %229 = vsyncpa [#allocation6], 1 }

</bundles_post_ra>
